<compile_context>
chip_gen: v6e
topology: v6e:2x2x1
jax: 0.10.0
libtpu: 0.0.40
codegen_flags: <defaults>
</compile_context>

<pallas_src>
import functools
from typing import NamedTuple

import jax
import jax.numpy as jnp
from jax.experimental import pallas as pl
from jax.experimental.pallas import tpu as pltpu

_SUBLANE = 8  # f32 sublane count


def _round_up(x, m):
    return ((x + m - 1) // m) * m


def _cdiv(a, b):
    return -(-a // b)


# ---------------------------------------------------------------------------
# Hardware detection: per-generation VMEM budget and MXU-friendly lane width.
# ---------------------------------------------------------------------------
@functools.lru_cache(maxsize=1)
def _chip_info():
    """Return (generation, usable_vmem_budget_bytes, lane_mult)."""
    gen = "unknown"
    vmem_cap = None
    try:
        info = pltpu.get_tpu_info()
        for attr in ("vmem_capacity_bytes", "vmem_bytes", "vmem_size_bytes"):
            v = getattr(info, attr, None)
            if v is not None:
                vmem_cap = int(v)
                break
    except Exception:
        vmem_cap = None
    try:
        kind = jax.devices()[0].device_kind.lower()
        for g in ("v7", "v6", "v5", "v4"):
            if g in kind:
                gen = g
                break
    except Exception:
        pass
    if vmem_cap is None or vmem_cap <= 0:
        vmem_cap = {"v7": 64 << 20, "v6": 128 << 20, "v5": 128 << 20}.get(gen, 64 << 20)
    # Usable budget: leave headroom below physical for Mosaic internal scratch.
    # v7x: 64 MiB is per-TensorCore and "parallel" keeps a resident weight
    # copy per TC, so budget against ~80% of it.  v5e/v6e: use the full
    # 128 MiB chip (clamped ~100 MiB) instead of a portability cap.
    if vmem_cap <= (64 << 20):
        budget = int(vmem_cap * 0.80)
    else:
        budget = min(int(vmem_cap * 0.80), 100 << 20)
    # v6e/v7x MXUs are 2x256^2: pad feature dims to 256 so a contraction /
    # output tile fills the systolic array; v5e's 4x128^2 saturates at 128.
    lane_mult = 256 if gen in ("v6", "v7") else 128
    return gen, budget, lane_mult


# ---------------------------------------------------------------------------
# One-time parameter preparation (models the persistent, broadcast DDP params).
# ---------------------------------------------------------------------------
class PreparedParams(NamedTuple):
    w1p: jax.Array      # (Dp, Hp)  compute_dtype, zero-padded
    b1p: jax.Array      # (1, Hp)   float32
    w2p: jax.Array      # (Hp, Np)  compute_dtype
    b2p: jax.Array      # (1, Np)   float32
    din: int
    hidden: int
    dout: int
    dp: int
    hp: int
    n_out_p: int
    h_chunk: int
    n_hchunks: int
    compute_dtype: jnp.dtype


def prepare_params(w1, b1, w2, b2, *, compute_dtype=jnp.bfloat16,
                   h_chunk_target=512):
    """Pad + cast the wrapped module's parameters once.

    w1: [Din, H]  (transposed vs torch Linear.weight)   b1: [H] or [1, H]
    w2: [H, Dout]                                        b2: [Dout] or [1, Dout]
    Zero padding is exact through matmul / bias / ReLU.
    """
    if b1.ndim == 1:
        b1 = b1.reshape(1, -1)
    if b2.ndim == 1:
        b2 = b2.reshape(1, -1)
    din, hidden = w1.shape
    hidden2, dout = w2.shape
    assert hidden2 == hidden, "weight shapes inconsistent"
    assert b1.shape == (1, hidden) and b2.shape == (1, dout), "bad bias shapes"

    _, _, lane_mult = _chip_info()
    dp = _round_up(din, lane_mult)
    n_out_p = _round_up(dout, lane_mult)
    # The hidden dim is chunked inside the kernel; make Hp a whole number of
    # identical lane-aligned chunks.
    hp0 = _round_up(hidden, lane_mult)
    n_hchunks = max(1, _cdiv(hp0, h_chunk_target))
    h_chunk = _round_up(_cdiv(hp0, n_hchunks), lane_mult)
    hp = h_chunk * n_hchunks

    cdt = jnp.dtype(compute_dtype)
    w1p = jnp.zeros((dp, hp), cdt).at[:din, :hidden].set(w1.astype(cdt))
    b1p = jnp.zeros((1, hp), jnp.float32).at[:, :hidden].set(b1.astype(jnp.float32))
    w2p = jnp.zeros((hp, n_out_p), cdt).at[:hidden, :dout].set(w2.astype(cdt))
    b2p = jnp.zeros((1, n_out_p), jnp.float32).at[:, :dout].set(b2.astype(jnp.float32))
    # TODO(synk): on v7x, optionally store w1p/w2p as fp8 (MXU fp8; no int8
    # path) with the same f32 epilogue to halve resident-weight VMEM again.
    return PreparedParams(w1p, b1p, w2p, b2p, din, hidden, dout,
                          dp, hp, n_out_p, h_chunk, n_hchunks, cdt)


# ---------------------------------------------------------------------------
# Kernel: per-batch-tile  out = relu(x @ W1 + b1) @ W2 + b2, H chunked.
# ---------------------------------------------------------------------------
def _make_mlp_kernel(n_hchunks, h_chunk):
    def kernel(x_ref, w1_ref, b1_ref, w2_ref, b2_ref, o_ref, acc_ref):
        x = x_ref[...]                       # (tb, Dp) compute_dtype
        acc_ref[...] = jnp.zeros_like(acc_ref)
        # Static, fully-unrolled loop; slices are tile-aligned (h_chunk is a
        # multiple of the lane width) so each chunk view is cheap.
        for c in range(n_hchunks):
            lo = c * h_chunk
            h = jnp.dot(x, w1_ref[:, lo:lo + h_chunk],
                        preferred_element_type=jnp.float32)
            h = jnp.maximum(h + b1_ref[:, lo:lo + h_chunk], 0.0)   # f32 epilogue
            acc_ref[...] += jnp.dot(h.astype(w2_ref.dtype),
                                    w2_ref[lo:lo + h_chunk, :],
                                    preferred_element_type=jnp.float32)
        o_ref[...] = (acc_ref[...] + b2_ref[...]).astype(o_ref.dtype)
    return kernel


# ---------------------------------------------------------------------------
# Forward pass of DDPOverlapIndividualParameters(wrapped MLP).
# ---------------------------------------------------------------------------
def ddp_forward(x, params: PreparedParams, *, tb=None, out_dtype=None):
    assert x.ndim == 2, "x must be [B, Din]"
    B, din = x.shape
    assert din == params.din, "x feature dim inconsistent with prepared params"
    if out_dtype is None:
        out_dtype = x.dtype

    cdt = params.compute_dtype
    itemsize = jnp.dtype(cdt).itemsize
    out_itemsize = jnp.dtype(out_dtype).itemsize
    dp, hp, n_out_p = params.dp, params.hp, params.n_out_p
    h_chunk = params.h_chunk

    gen, vmem_budget, lane_mult = _chip_info()
    row_align = lane_mult

    # ---- VMEM accounting --------------------------------------------------
    # Resident weights/biases are single-buffered (constant block index).
    weight_vmem = (dp * hp + hp * n_out_p) * itemsize + (hp + n_out_p) * 4
    headroom = 4 << 20
    # Per batch-row bytes: x double-buffer + out double-buffer + f32
    # accumulator scratch + per-chunk hidden activation (f32) + its MXU-dtype
    # cast copy.
    per_row = (2 * dp * itemsize + 2 * n_out_p * out_itemsize
               + n_out_p * 4 + h_chunk * (4 + itemsize))
    avail = vmem_budget - weight_vmem - headroom
    if avail <= per_row * _SUBLANE:
        # TODO(synk): weights too large to stay resident on this generation;
        # fall back to streaming W1/W2 over an H-tile grid axis.
        avail = per_row * _SUBLANE
    tb_budget = max(_SUBLANE, avail // per_row)

    # ---- batch tiling: MXU-aligned tiles, bounded padding waste ------------
    if tb is None:
        tb_max = min(int(tb_budget), 1024)
        tb_max = max(_SUBLANE, (tb_max // _SUBLANE) * _SUBLANE)
        if B <= tb_max:
            n_tiles = 1
            tb = _round_up(B, _SUBLANE)
            # v7x has 2 TensorCores: split a single large tile so the
            # "parallel" batch axis can occupy both cores.
            if gen == "v7" and tb >= 2 * row_align:
                n_tiles = 2
                tb = _round_up(_cdiv(B, 2), row_align)
        else:
            n_tiles = _cdiv(B, tb_max)
            if gen == "v7" and (n_tiles % 2):
                n_tiles += 1                      # keep both TCs busy
            tb = _round_up(_cdiv(B, n_tiles), row_align)
            tb = max(_SUBLANE, min(tb, tb_max))
            n_tiles = _cdiv(B, tb)
    else:
        tb = max(_SUBLANE, _round_up(int(tb), _SUBLANE))
        n_tiles = _cdiv(B, tb)
    bp = tb * n_tiles
    grid = (n_tiles,)

    # ---- x padding: fast path when already aligned --------------------------
    if bp == B and dp == din and x.dtype == cdt:
        xp = x
    else:
        xp = jnp.zeros((bp, dp), cdt).at[:B, :din].set(x.astype(cdt))

    # ---- cost estimate / vmem limit -----------------------------------------
    flops = 2 * bp * (dp * hp + hp * n_out_p)
    bytes_accessed = ((bp * dp + dp * hp + hp * n_out_p) * itemsize
                      + (hp + n_out_p) * 4
                      + bp * n_out_p * out_itemsize)
    cost = pl.CostEstimate(flops=int(flops), transcendentals=0,
                           bytes_accessed=int(bytes_accessed))
    need = weight_vmem + tb * per_row + headroom
    vmem_limit = int(min(max(int(need * 1.25), 32 << 20), vmem_budget))

    kernel = _make_mlp_kernel(params.n_hchunks, h_chunk)
    resident = lambda i: (0, 0)
    out = pl.pallas_call(
        kernel,
        out_shape=jax.ShapeDtypeStruct((bp, n_out_p), out_dtype),
        grid_spec=pltpu.PrefetchScalarGridSpec(
            num_scalar_prefetch=0,
            grid=grid,
            in_specs=[
                # x: streamed over the (parallel) batch axis, double-buffered.
                pl.BlockSpec((tb, dp), lambda i: (i, 0)),
                # Weights / biases: constant block index -> single-buffered.
                pl.BlockSpec((dp, hp), resident, pipeline_mode=pl.Buffered(1)),
                pl.BlockSpec((1, hp), resident, pipeline_mode=pl.Buffered(1)),
                pl.BlockSpec((hp, n_out_p), resident, pipeline_mode=pl.Buffered(1)),
                pl.BlockSpec((1, n_out_p), resident, pipeline_mode=pl.Buffered(1)),
            ],
            out_specs=pl.BlockSpec((tb, n_out_p), lambda i: (i, 0)),
            scratch_shapes=[pltpu.VMEM((tb, n_out_p), jnp.float32)],
        ),
        compiler_params=pltpu.CompilerParams(
            dimension_semantics=("parallel",),
            vmem_limit_bytes=vmem_limit,
        ),
        cost_estimate=cost,
    )(xp, params.w1p, params.b1p, params.w2p, params.b2p)

    # Skip the output slice (a full extra HBM round trip) when already aligned.
    if bp == B and n_out_p == params.dout:
        return out
    return out[:B, :params.dout]


def ddp_wrapped_mlp_forward(x, w1, b1, w2, b2, *, tb=None,
                            compute_dtype=jnp.bfloat16, out_dtype=None):
    """Convenience path: pad/cast params on the fly, then run the kernel.

    For repeated DDP steps, call prepare_params() once and reuse it with
    ddp_forward() so the weight pad/cast copies are not paid per forward.
    """
    params = prepare_params(w1, b1, w2, b2, compute_dtype=compute_dtype)
    return ddp_forward(x, params, tb=tb, out_dtype=out_dtype)


def init_params(key, din, hidden, dout, dtype=jnp.float32):
    """Deterministic 'rank 0' parameters (models _broadcast_parameters())."""
    k1, k2, k3, k4 = jax.random.split(key, 4)
    w1 = jax.random.normal(k1, (din, hidden), dtype) * (1.0 / jnp.sqrt(din))
    b1 = jax.random.normal(k2, (1, hidden), dtype) * 0.01
    w2 = jax.random.normal(k3, (hidden, dout), dtype) * (1.0 / jnp.sqrt(hidden))
    b2 = jax.random.normal(k4, (1, dout), dtype) * 0.01
    return w1, b1, w2, b2


def reference_forward(x, w1, b1, w2, b2):
    h = jnp.maximum(x @ w1 + b1, 0.0)
    return h @ w2 + b2


# TODO(synk): backward-hook async all-reduce of per-parameter gradients
# (the DDP "overlap") is multi-device backward communication, not forward
# compute; on multi-chip it maps to pltpu.make_async_remote_copy + barrier
# semaphores and is intentionally not emulated here.

if __name__ == "__main__":
    key = jax.random.PRNGKey(0)
    kx, kp, kx2 = jax.random.split(key, 3)

    batch, din, hidden, dout = 8, 32, 64, 16
    x = jax.random.normal(kx, (batch, din), jnp.float32)
    w1, b1, w2, b2 = init_params(kp, din, hidden, dout)
    ref = reference_forward(x, w1, b1, w2, b2)

    # (1) f32 MXU operands via prepared (pad-once) params: tight tolerance.
    params_f32 = prepare_params(w1, b1, w2, b2, compute_dtype=jnp.float32)
    out = jax.block_until_ready(ddp_forward(x, params_f32))
    assert out.shape == (batch, dout), out.shape
    assert jnp.allclose(out, ref, atol=1e-5, rtol=1e-5), "mismatch vs reference (f32)"

    # (2) default bf16 MXU operands (f32 accumulate + epilogue): loose tolerance.
    out_bf = jax.block_until_ready(ddp_wrapped_mlp_forward(x, w1, b1, w2, b2))
    assert out_bf.shape == (batch, dout), out_bf.shape
    assert jnp.allclose(out_bf, ref, atol=5e-2, rtol=5e-2), "mismatch vs reference (bf16)"

    # (3) multi-step pipelined grid + pad/slice path (B=24, tb=8 -> grid=(3,)).
    x2 = jax.random.normal(kx2, (24, din), jnp.float32)
    out2 = jax.block_until_ready(ddp_forward(x2, params_f32, tb=8))
    ref2 = reference_forward(x2, w1, b1, w2, b2)
    assert out2.shape == (24, dout), out2.shape
    assert jnp.allclose(out2, ref2, atol=1e-5, rtol=1e-5), "mismatch (tiled grid)"

    print("KERNEL_OK")
</pallas_src>

<mosaic_0001>
module attributes {stable_mosaic.version = 11 : i64} {
  func.func @kernel(%arg0: i32, %arg1: memref<8x128xf32, #tpu.memory_space<vmem>>, %arg2: memref<128x128xf32, #tpu.memory_space<vmem>>, %arg3: memref<1x128xf32, #tpu.memory_space<vmem>>, %arg4: memref<128x128xf32, #tpu.memory_space<vmem>>, %arg5: memref<1x128xf32, #tpu.memory_space<vmem>>, %arg6: memref<8x128xf32, #tpu.memory_space<vmem>>, %arg7: memref<8x128xf32, #tpu.memory_space<vmem>>) attributes {dimension_semantics = [#tpu.dimension_semantics<parallel>], iteration_bounds = array<i64: 1>, scalar_prefetch = 0 : i64, scratch_operands = 1 : i64, tpu.core_type = #tpu.core_type<tc>, window_params = [{transform_indices = @transform_0, window_bounds = array<i64: 8, 128>}, {pipeline_mode = #tpu.pipeline_mode<synchronous>, transform_indices = @transform_1, window_bounds = array<i64: 128, 128>}, {pipeline_mode = #tpu.pipeline_mode<synchronous>, transform_indices = @transform_2, window_bounds = array<i64: 1, 128>}, {pipeline_mode = #tpu.pipeline_mode<synchronous>, transform_indices = @transform_3, window_bounds = array<i64: 128, 128>}, {pipeline_mode = #tpu.pipeline_mode<synchronous>, transform_indices = @transform_4, window_bounds = array<i64: 1, 128>}, {transform_indices = @transform_5, window_bounds = array<i64: 8, 128>}]} {
    %c0 = arith.constant 0 : index
    %c0_0 = arith.constant 0 : index
    %0 = vector.load %arg1[%c0, %c0_0] : memref<8x128xf32, #tpu.memory_space<vmem>>, vector<8x128xf32>
    %cst = arith.constant 0.000000e+00 : f32
    %1 = vector.broadcast %cst : f32 to vector<8x128xf32>
    %c0_1 = arith.constant 0 : index
    %c0_2 = arith.constant 0 : index
    %2 = vector.load %arg7[%c0_1, %c0_2] : memref<8x128xf32, #tpu.memory_space<vmem>>, vector<8x128xf32>
    tpu.vector_store %arg7[%c0_1, %c0_2], %1 {strides = array<i32>} : memref<8x128xf32, #tpu.memory_space<vmem>>, vector<8x128xf32>,
    %c0_3 = arith.constant 0 : index
    %c0_4 = arith.constant 0 : index
    %3 = vector.load %arg2[%c0_3, %c0_4] : memref<128x128xf32, #tpu.memory_space<vmem>>, vector<128x128xf32>
    %cst_5 = arith.constant dense<0.000000e+00> : vector<8x128xf32>
    %4 = tpu.matmul %0, %3, %cst_5 {dimension_numbers = #tpu.dot_dimension_numbers<[1], [0], [0], [1], [0, 0, 1, 1], [], []>} : vector<8x128xf32>, vector<128x128xf32>, vector<8x128xf32> -> vector<8x128xf32>
    %c0_6 = arith.constant 0 : index
    %c0_7 = arith.constant 0 : index
    %5 = vector.load %arg3[%c0_6, %c0_7] : memref<1x128xf32, #tpu.memory_space<vmem>>, vector<1x128xf32>
    %6 = vector.broadcast %5 : vector<1x128xf32> to vector<8x128xf32>
    %7 = arith.addf %4, %6 : vector<8x128xf32>
    %cst_8 = arith.constant 0.000000e+00 : f32
    %8 = vector.broadcast %cst_8 : f32 to vector<8x128xf32>
    %9 = arith.maximumf %7, %8 : vector<8x128xf32>
    %c0_9 = arith.constant 0 : index
    %c0_10 = arith.constant 0 : index
    %10 = vector.load %arg7[%c0_9, %c0_10] : memref<8x128xf32, #tpu.memory_space<vmem>>, vector<8x128xf32>
    %c0_11 = arith.constant 0 : index
    %c0_12 = arith.constant 0 : index
    %11 = vector.load %arg4[%c0_11, %c0_12] : memref<128x128xf32, #tpu.memory_space<vmem>>, vector<128x128xf32>
    %cst_13 = arith.constant dense<0.000000e+00> : vector<8x128xf32>
    %12 = tpu.matmul %9, %11, %cst_13 {dimension_numbers = #tpu.dot_dimension_numbers<[1], [0], [0], [1], [0, 0, 1, 1], [], []>} : vector<8x128xf32>, vector<128x128xf32>, vector<8x128xf32> -> vector<8x128xf32>
    %13 = arith.addf %10, %12 : vector<8x128xf32>
    %c0_14 = arith.constant 0 : index
    %c0_15 = arith.constant 0 : index
    %14 = vector.load %arg7[%c0_14, %c0_15] : memref<8x128xf32, #tpu.memory_space<vmem>>, vector<8x128xf32>
    tpu.vector_store %arg7[%c0_14, %c0_15], %13 {strides = array<i32>} : memref<8x128xf32, #tpu.memory_space<vmem>>, vector<8x128xf32>,
    %c0_16 = arith.constant 0 : index
    %c0_17 = arith.constant 0 : index
    %15 = vector.load %arg7[%c0_16, %c0_17] : memref<8x128xf32, #tpu.memory_space<vmem>>, vector<8x128xf32>
    %c0_18 = arith.constant 0 : index
    %c0_19 = arith.constant 0 : index
    %16 = vector.load %arg5[%c0_18, %c0_19] : memref<1x128xf32, #tpu.memory_space<vmem>>, vector<1x128xf32>
    %17 = vector.broadcast %16 : vector<1x128xf32> to vector<8x128xf32>
    %18 = arith.addf %15, %17 : vector<8x128xf32>
    %c0_20 = arith.constant 0 : index
    %c0_21 = arith.constant 0 : index
    %19 = vector.load %arg6[%c0_20, %c0_21] : memref<8x128xf32, #tpu.memory_space<vmem>>, vector<8x128xf32>
    tpu.vector_store %arg6[%c0_20, %c0_21], %18 {strides = array<i32>} : memref<8x128xf32, #tpu.memory_space<vmem>>, vector<8x128xf32>,
    return
  }
  func.func @transform_0(%arg0: i32) -> (i32, i32) {
    %c0_i32 = arith.constant 0 : i32
    %c0_i32_0 = arith.constant 0 : i32
    return %arg0, %c0_i32 : i32, i32
  }
  func.func @transform_1(%arg0: i32) -> (i32, i32) {
    %c0_i32 = arith.constant 0 : i32
    %c0_i32_0 = arith.constant 0 : i32
    %c0_i32_1 = arith.constant 0 : i32
    return %c0_i32, %c0_i32_0 : i32, i32
  }
  func.func @transform_2(%arg0: i32) -> (i32, i32) {
    %c0_i32 = arith.constant 0 : i32
    %c0_i32_0 = arith.constant 0 : i32
    %c0_i32_1 = arith.constant 0 : i32
    return %c0_i32, %c0_i32_0 : i32, i32
  }
  func.func @transform_3(%arg0: i32) -> (i32, i32) {
    %c0_i32 = arith.constant 0 : i32
    %c0_i32_0 = arith.constant 0 : i32
    %c0_i32_1 = arith.constant 0 : i32
    return %c0_i32, %c0_i32_0 : i32, i32
  }
  func.func @transform_4(%arg0: i32) -> (i32, i32) {
    %c0_i32 = arith.constant 0 : i32
    %c0_i32_0 = arith.constant 0 : i32
    %c0_i32_1 = arith.constant 0 : i32
    return %c0_i32, %c0_i32_0 : i32, i32
  }
  func.func @transform_5(%arg0: i32) -> (i32, i32) {
    %c0_i32 = arith.constant 0 : i32
    %c0_i32_0 = arith.constant 0 : i32
    return %arg0, %c0_i32 : i32, i32
  }
}

</mosaic_0001>

<bundles_post_ra>
// kernel: tpu_custom_call.1
= control target key start
LH: loop header
LB: loop body
LE: loop exit
PB: predicated region body
PF: predicated region fallthrough
CT: control target
= control target key end

     0   :  { %10 = vsyncpa [#allocation4], 0  ;;  %s561_s0 = inlined_call_operand.hbm [shape: f32[8,128], index: 0, kind: input, shape index: {}]   ;;  %s562_s1 = inlined_call_operand.hbm [shape: f32[128,128], index: 1, kind: input, shape index: {}]   ;;  %s563_s2 = inlined_call_operand.vmem [shape: f32[1,128], index: 2, kind: input, shape index: {}]   ;;  %s564_s3 = inlined_call_operand.hbm [shape: f32[128,128], index: 3, kind: input, shape index: {}]   ;;  %s565_s4 = inlined_call_operand.vmem [shape: f32[1,128], index: 4, kind: input, shape index: {}]   ;;  %s566_s5 = inlined_call_operand.hbm [shape: f32[8,128], index: 5, kind: output, shape index: {}]  }
   0x1   :  { %11 = vsyncpa [#allocation7], 0 }
   0x2   :  { %12 = vsyncpa [#allocation5], 0  ;;  %s471_s18 = smov [#allocation6]  }
   0x3   :  { %s28_s19 = sshll.u32 %s471_s18, 4  ;;  %s29_s19 = int_to_ptr.vmem [resolvable:$true] %s28_s19 }
   0x4   :  { %s393_s20 = scalar_lea.vmem %s29_s19, 2048  ;;  %p398_p1 = scmp.lt.s32.totalorder %s29_s19, %s29_s19 }
   0x5   :  { %p394_p0 = scmp.ne.s32.totalorder %s29_s19, %s393_s20  ;;  %p399_p2 = scmp.lt.s32.totalorder %s393_s20, %s393_s20 }
   0x7   :  { %p400_p3 = por %p399_p2, %p398_p1 }
   0x9   :  { %p401_p4 = pnand %p400_p3, %p394_p0 }
   0xb   :  { %404 = shalt.err (!%p401_p4)
}
   0xc   :  { %s472_s21 = smov 128   ;;  %s473_s22 = smov 8  }
   0xd   :  { %34 = dma.hbm_to_vmem [thread:$0]  %s562_s1, 2048, %s29_s19, [#allocation7], %s472_s21, %s472_s21, %s473_s22  }
   0xe   :  { %s474_s25 = smov [#allocation3]   ;;  %s475_s27 = smov [#allocation8]  }
   0xf   :  { %s19_s26 = sshll.u32 %s474_s25, 4  ;;  %s42_s28 = sshll.u32 %s475_s27, 4  ;;  %s20_s26 = int_to_ptr.vmem [resolvable:$true] %s19_s26  ;;  %s43_s28 = int_to_ptr.vmem [resolvable:$true] %s42_s28 }
  0x10   :  { %s413_s29 = scalar_lea.vmem %s20_s26, 128  ;;  %p418_p6 = scmp.lt.s32.totalorder %s20_s26, %s20_s26 }
  0x11   :  { %p414_p5 = scmp.ne.s32.totalorder %s20_s26, %s413_s29  ;;  %p419_p7 = scmp.lt.s32.totalorder %s413_s29, %s413_s29 }
  0x13   :  { %p420_p8 = por %p419_p7, %p418_p6 }
  0x15   :  { %p421_p9 = pnand %p420_p8, %p414_p5 }
  0x17   :  { %424 = shalt.err (!%p421_p9)
}
  0x18   :  { %22 = dma.hbm_to_vmem [thread:$0]  %s561_s0, 128, %s20_s26, [#allocation4]  }
  0x19   :  { %s433_s7 = scalar_lea.vmem %s43_s28, 2048  ;;  %p438_p11 = scmp.lt.s32.totalorder %s43_s28, %s43_s28 }
  0x1a   :  { %p434_p10 = scmp.ne.s32.totalorder %s43_s28, %s433_s7  ;;  %p439_p12 = scmp.lt.s32.totalorder %s433_s7, %s433_s7 }
  0x1c   :  { %p440_p13 = por %p439_p12, %p438_p11 }
  0x1e   :  { %p441_p0 = pnand %p440_p13, %p434_p10 }
  0x20   :  { %444 = shalt.err (!%p441_p0)
}
  0x21   :  { %48 = dma.hbm_to_vmem [thread:$0]  %s564_s3, 2048, %s43_s28, [#allocation7], %s472_s21, %s472_s21, %s473_s22  }
  0x22   :  { %465 = dma.done.wait [#allocation4], 128  }
  0x23   :  { %466 = vsyncadd [#allocation4], 4294967168 }
  0x24   :  { %467 = dma.done.wait [#allocation7], 4096  }
  0x25   :  { %468 = vsyncadd [#allocation7], 4294963200  ;;  %v476_v0 = vmov 0.0   ;;  %vm477_vm0 = vmmov 0   ;;  %v77_v1 = vld [vmem:[#allocation6 + $0x78] sm:$0xff]  ;;  %v76_v2 = vld [vmem:[#allocation6 + $0x70] sm:$0xff] }
  0x26   :  { %307 = vmatprep.subr.mxu0 %v476_v0  ;;  %339 = vmatprep.mubr.msk.f32.mxu0 %vm477_vm0, %v476_v0  ;;  %v75_v3 = vld [vmem:[#allocation6 + $0x68] sm:$0xff]  ;;  %v74_v4 = vld [vmem:[#allocation6 + $0x60] sm:$0xff]  ;;  %v172_v5 = vld [vmem:[#allocation8 + $0x78] sm:$0xff]  ;;  %s478_s11 = smov [#allocation9]  }
  0x27   :  { %342 = vmatprep.subr.mxu1 %v476_v0  ;;  %374 = vmatprep.mubr.msk.f32.mxu1 %vm477_vm0, %v476_v0  ;;  %v73_v6 = vld [vmem:[#allocation6 + $0x58] sm:$0xff]  ;;  %v171_v7 = vld [vmem:[#allocation8 + $0x70] sm:$0xff]  ;;  %v170_v8 = vld [vmem:[#allocation8 + $0x68] sm:$0xff]  ;;  %s261_s12 = sshll.u32 %s478_s11, 4  ;;  %s262_s12 = int_to_ptr.vmem [resolvable:$true] %s261_s12 }
  0x28   :  { %308 = vmatpush3.msra.mxu0 %v77_v1  ;;  %343 = vmatpush3.msra.mxu1 %v172_v5  ;;  %v72_v9 = vld [vmem:[#allocation6 + $0x50] sm:$0xff]  ;;  %v169_v10 = vld [vmem:[#allocation8 + $0x60] sm:$0xff]  ;;  %v71_v11 = vld [vmem:[#allocation6 + $0x48] sm:$0xff]  ;;  %s445_s13 = scalar_lea.vmem %s262_s12, 128  ;;  %p450_p2 = scmp.lt.s32.totalorder %s262_s12, %s262_s12 }
  0x29   :  { %309 = vmatprep.subr.mxu0 %v476_v0  ;;  %344 = vmatprep.subr.mxu1 %v476_v0  ;;  %v168_v12 = vld [vmem:[#allocation8 + $0x58] sm:$0xff]  ;;  %v70_v13 = vld [vmem:[#allocation6 + $0x40] sm:$0xff]  ;;  %v167_v14 = vld [vmem:[#allocation8 + $0x50] sm:$0xff]  ;;  %p446_p1 = scmp.ne.s32.totalorder %s262_s12, %s445_s13  ;;  %p451_p3 = scmp.lt.s32.totalorder %s445_s13, %s445_s13 }
  0x2a   :  { %310 = vmatpush3.msra.mxu0 %v76_v2  ;;  %345 = vmatpush3.msra.mxu1 %v171_v7  ;;  %v69_v15 = vld [vmem:[#allocation6 + $0x38] sm:$0xff]  ;;  %v166_v16 = vld [vmem:[#allocation8 + $0x48] sm:$0xff]  ;;  %v68_v17 = vld [vmem:[#allocation6 + $0x30] sm:$0xff] }
  0x2b   :  { %311 = vmatprep.subr.mxu0 %v476_v0  ;;  %346 = vmatprep.subr.mxu1 %v476_v0  ;;  %v165_v18 = vld [vmem:[#allocation8 + $0x40] sm:$0xff]  ;;  %v67_v19 = vld [vmem:[#allocation6 + $0x28] sm:$0xff]  ;;  %v164_v20 = vld [vmem:[#allocation8 + $0x38] sm:$0xff]  ;;  %p452_p4 = por %p451_p3, %p450_p2 }
  0x2c   :  { %312 = vmatpush3.msra.mxu0 %v75_v3  ;;  %347 = vmatpush3.msra.mxu1 %v170_v8  ;;  %v66_v21 = vld [vmem:[#allocation6 + $0x20] sm:$0xff]  ;;  %v163_v22 = vld [vmem:[#allocation8 + $0x30] sm:$0xff]  ;;  %v65_v23 = vld [vmem:[#allocation6 + $0x18] sm:$0xff] }
  0x2d   :  { %313 = vmatprep.subr.mxu0 %v476_v0  ;;  %348 = vmatprep.subr.mxu1 %v476_v0  ;;  %v162_v24 = vld [vmem:[#allocation8 + $0x28] sm:$0xff]  ;;  %v64_v25 = vld [vmem:[#allocation6 + $0x10] sm:$0xff]  ;;  %v161_v26 = vld [vmem:[#allocation8 + $0x20] sm:$0xff]  ;;  %p453_p5 = pnand %p452_p4, %p446_p1 }
  0x2e   :  { %314 = vmatpush3.msra.mxu0 %v74_v4  ;;  %349 = vmatpush3.msra.mxu1 %v169_v10  ;;  %v63_v27 = vld [vmem:[#allocation6 + $0x8] sm:$0xff]  ;;  %v160_v28 = vld [vmem:[#allocation8 + $0x18] sm:$0xff]  ;;  %v62_v29 = vld [vmem:[#allocation6] sm:$0xff] }
  0x2f   :  { %315 = vmatprep.subr.mxu0 %v476_v0  ;;  %350 = vmatprep.subr.mxu1 %v476_v0  ;;  %v60_v30 = vld [vmem:[#allocation3] sm:$0xff]  ;;  %v159_v31 = vld [vmem:[#allocation8 + $0x10] sm:$0xff]  ;;  %v158_v32 = vld [vmem:[#allocation8 + $0x8] sm:$0xff] }
  0x30   :  { %316 = vmatpush3.msra.mxu0 %v73_v6  ;;  %351 = vmatpush3.msra.mxu1 %v168_v12  ;;  %v157_v33 = vld [vmem:[#allocation8] sm:$0xff]  ;;  %v271_v34 = vld [vmem:[%s563_s2] ss:$0 sm:$0xff] }
  0x31   :  { %317 = vmatprep.subr.mxu0 %v476_v0  ;;  %352 = vmatprep.subr.mxu1 %v476_v0  ;;  %v272_v39 = vld [vmem:[%s565_s4] ss:$0 sm:$0xff] }
  0x32   :  { %318 = vmatpush3.msra.mxu0 %v72_v9  ;;  %353 = vmatpush3.msra.mxu1 %v167_v14 }
  0x33   :  { %319 = vmatprep.subr.mxu0 %v476_v0  ;;  %354 = vmatprep.subr.mxu1 %v476_v0 }
  0x34   :  { %320 = vmatpush3.msra.mxu0 %v71_v11  ;;  %355 = vmatpush3.msra.mxu1 %v166_v16 }
  0x35   :  { %321 = vmatprep.subr.mxu0 %v476_v0  ;;  %356 = vmatprep.subr.mxu1 %v476_v0 }
  0x36   :  { %322 = vmatpush3.msra.mxu0 %v70_v13  ;;  %357 = vmatpush3.msra.mxu1 %v165_v18 }
  0x37   :  { %323 = vmatprep.subr.mxu0 %v476_v0  ;;  %358 = vmatprep.subr.mxu1 %v476_v0 }
  0x38   :  { %324 = vmatpush3.msra.mxu0 %v69_v15  ;;  %359 = vmatpush3.msra.mxu1 %v164_v20 }
  0x39   :  { %325 = vmatprep.subr.mxu0 %v476_v0  ;;  %360 = vmatprep.subr.mxu1 %v476_v0 }
  0x3a   :  { %326 = vmatpush3.msra.mxu0 %v68_v17  ;;  %361 = vmatpush3.msra.mxu1 %v163_v22 }
  0x3b   :  { %327 = vmatprep.subr.mxu0 %v476_v0  ;;  %362 = vmatprep.subr.mxu1 %v476_v0 }
  0x3c   :  { %328 = vmatpush3.msra.mxu0 %v67_v19  ;;  %363 = vmatpush3.msra.mxu1 %v162_v24 }
  0x3d   :  { %329 = vmatprep.subr.mxu0 %v476_v0  ;;  %364 = vmatprep.subr.mxu1 %v476_v0 }
  0x3e   :  { %330 = vmatpush3.msra.mxu0 %v66_v21  ;;  %365 = vmatpush3.msra.mxu1 %v161_v26 }
  0x3f   :  { %331 = vmatprep.subr.mxu0 %v476_v0  ;;  %366 = vmatprep.subr.mxu1 %v476_v0 }
  0x40   :  { %332 = vmatpush3.msra.mxu0 %v65_v23  ;;  %367 = vmatpush3.msra.mxu1 %v160_v28 }
  0x41   :  { %333 = vmatprep.subr.mxu0 %v476_v0  ;;  %368 = vmatprep.subr.mxu1 %v476_v0 }
  0x42   :  { %334 = vmatpush3.msra.mxu0 %v64_v25  ;;  %369 = vmatpush3.msra.mxu1 %v159_v31 }
  0x43   :  { %335 = vmatprep.subr.mxu0 %v476_v0  ;;  %370 = vmatprep.subr.mxu1 %v476_v0 }
  0x44   :  { %336 = vmatpush3.msra.mxu0 %v63_v27  ;;  %371 = vmatpush3.msra.mxu1 %v158_v32 }
  0x45   :  { %337 = vmatprep.subr.mxu0 %v476_v0  ;;  %372 = vmatprep.subr.mxu1 %v476_v0 }
  0x46   :  { %338 = vmatpush3.msra.mxu0 %v62_v29  ;;  %373 = vmatpush3.msra.mxu1 %v157_v33 }
  0x47   :  { %340 = vmatmul.mubr.f32.vlgmr.msra.gmra.mxu0 %v60_v30 }
 0x107   :  { %v151_v35 = vpop.f32.mrf.mxu0 }
 0x108   :  { %v152_v36 = vadd.f32 %v271_v34, %v151_v35 }
 0x109   :  { %v341_v37 = vpop.f32.mrf.mxu0 }
 0x10a   :  { %v155_v38 = vmax.f32 %v152_v36, 0.0 }
 0x10c   :  { %375 = vmatmul.mubr.f32.vlgmr.msra.gmra.mxu1 %v155_v38 }
 0x1cc   :  { %v239_v40 = vpop.f32.mrf.mxu1 }
 0x1cd   :  { %v253_v41 = vadd.f32 %v272_v39, %v239_v40 }
 0x1ce   :  { %v376_v42 = vpop.f32.mrf.mxu1 }
 0x1cf   :  { %254 = vst [vmem:[#allocation9] sm:$0xff] %v253_v41 }
 0x1d0   :  { %456 = shalt.err (!%p453_p5)
}
 0x1d1   :  { %264 = dma.vmem_to_hbm [thread:$0]  %s262_s12, 128, %s566_s5, [#allocation5]  }
 0x1d2   :  { %469 = dma.done.wait [#allocation5], 128  }
 0x1d3   :  { %470 = vsyncadd [#allocation5], 4294967168 }
 0x1d4   :  { %268 = vsyncpa [#allocation4], 1 }
 0x1d5   :  { %269 = vsyncpa [#allocation7], 1 }
 0x1d6   :  { %270 = vsyncpa [#allocation5], 1 }

</bundles_post_ra>
